<compile_context>
chip_gen: v7x
topology: tpu7x:2x2x1
jax: 0.10.0
libtpu: 0.0.40
codegen_flags: <defaults>
</compile_context>

<pallas_src>
import functools

import jax
import jax.numpy as jnp
from jax.experimental import pallas as pl
from jax.experimental.pallas import tpu as pltpu


def _anfis_kernel(num_mf, cr, n_chunks,
                  m1_ref, s1_ref, m2_ref, s2_ref, a1_ref, a2_ref, b_ref,
                  x_ref, y_ref):
    # m1/s1/m2/s2: (num_mf,) f32 in SMEM   (s* = -0.5 / sigma**2, precomputed)
    # a1/a2/b:     (num_mf**2,) f32 in SMEM
    # x:           (2, tr, 128) f32 batch tile (x1 = x[0], x2 = x[1])
    # y:           (tr, 128) f32 output tile
    # Inner loop over cr-row chunks keeps live vregs bounded while the big
    # VMEM tile amortizes per-grid-step overhead.

    @pl.loop(0, n_chunks)
    def _(c):
        r0 = pl.multiple_of(c * cr, cr)
        x1 = x_ref[0, pl.ds(r0, cr), :]
        x2 = x_ref[1, pl.ds(r0, cr), :]

        # Membership values: num_mf exps per input feature, on dense vregs.
        mf1 = []
        mf2 = []
        for i in range(num_mf):
            d1 = x1 - m1_ref[i]
            mf1.append(jnp.exp(s1_ref[i] * (d1 * d1)))
            d2 = x2 - m2_ref[i]
            mf2.append(jnp.exp(s2_ref[i] * (d2 * d2)))

        # den = (sum_i mf1[i]) * (sum_j mf2[j])  -- factored, no per-rule work.
        sum1 = mf1[0]
        sum2 = mf2[0]
        for i in range(1, num_mf):
            sum1 = sum1 + mf1[i]
            sum2 = sum2 + mf2[i]
        den = sum1 * sum2

        # num = sum_i mf1[i] * (sum_j mf2[j] * f_ij)
        num = None
        for i in range(num_mf):
            inner = None
            for j in range(num_mf):
                r = i * num_mf + j
                f = jnp.tanh(a1_ref[r] * x1 + a2_ref[r] * x2 + b_ref[r])
                t = mf2[j] * f
                inner = t if inner is None else inner + t
            term = mf1[i] * inner
            num = term if num is None else num + term

        # Approx reciprocal on the EUP (slack) + one Newton step (VALU) keeps
        # the result within ~1 ulp of an exact f32 divide.
        inv = pl.reciprocal(den, approx=True)
        inv = inv * (2.0 - den * inv)
        y_ref[pl.ds(r0, cr), :] = num * inv


def _neg_half_inv_var(raw_sigma):
    # torch.nn.functional.softplus (beta=1, threshold=20 passthrough) + 0.001,
    # folded into the constant -0.5 / sigma**2. Done once, on num_mf elements.
    raw = raw_sigma.astype(jnp.float32)
    sp = jnp.where(raw > 20.0, raw, jnp.log1p(jnp.exp(raw)))
    sigma = sp + 0.001
    return (-0.5) / (sigma * sigma)


def anfis_forward(x, mean1, raw_sigma1, mean2, raw_sigma2, a1, a2, b,
                  *, block_b=262144):
    """x: (batch, 2) f32 -> y: (batch,) f32 (ANFISNet.forward)."""
    assert x.ndim == 2 and x.shape[1] == 2
    batch = x.shape[0]
    num_mf = int(mean1.shape[0])
    num_rules = num_mf * num_mf
    assert a1.shape == (num_rules,) and a2.shape == (num_rules,) and b.shape == (num_rules,)
    assert block_b % 1024 == 0, "block_b must be a multiple of 1024 (8 sublanes x 128 lanes)"

    # Pad batch so it can be viewed as (rows, 128) with rows a multiple of 8
    # per tile. Force >= 2 grid steps whenever possible so both v7x
    # TensorCores get work; pick near-even block sizes to minimize padding.
    b_pad = ((batch + 1023) // 1024) * 1024
    steps = max(2 if b_pad >= 2048 else 1, -(-b_pad // block_b))
    blk = -(-b_pad // steps)
    blk = ((blk + 1023) // 1024) * 1024
    b_pad = blk * steps
    grid = (steps,)

    tr = blk // 128                       # sublane rows per tile (multiple of 8)
    rows = b_pad // 128
    cr = 16 if tr % 16 == 0 else 8        # rows per inner chunk (1-2 vregs wide)
    n_chunks = tr // cr

    # Pack x1/x2 as a single (2, rows, 128) slab: one DMA stream per step.
    xT = x.astype(jnp.float32).T          # (2, batch)
    if b_pad != batch:
        # Padded lanes produce finite values (centers ~[0.2,0.8]); sliced off below.
        xT = jnp.pad(xT, ((0, 0), (0, b_pad - batch)))
    x_packed = xT.reshape(2, rows, 128)

    s1 = _neg_half_inv_var(raw_sigma1)
    s2 = _neg_half_inv_var(raw_sigma2)

    x_spec = pl.BlockSpec((2, tr, 128), lambda i, *_: (0, i, 0))
    y_spec = pl.BlockSpec((tr, 128), lambda i, *_: (i, 0))

    y_2d = pl.pallas_call(
        functools.partial(_anfis_kernel, num_mf, cr, n_chunks),
        out_shape=jax.ShapeDtypeStruct((rows, 128), jnp.float32),
        grid_spec=pltpu.PrefetchScalarGridSpec(
            num_scalar_prefetch=7,           # mean1, s1, mean2, s2, a1, a2, b -> SMEM
            grid=grid,
            in_specs=[x_spec],
            out_specs=y_spec,
        ),
        compiler_params=pltpu.CompilerParams(
            dimension_semantics=("parallel",),
            vmem_limit_bytes=32 * 1024 * 1024,
        ),
    )(
        mean1.astype(jnp.float32), s1,
        mean2.astype(jnp.float32), s2,
        a1.astype(jnp.float32), a2.astype(jnp.float32), b.astype(jnp.float32),
        x_packed,
    )
    return y_2d.reshape(b_pad)[:batch]


def _reference(x, mean1, raw_sigma1, mean2, raw_sigma2, a1, a2, b):
    """Pure-JAX transcription of ANFISNet.forward."""
    def mf(v, mean, raw):
        sigma = jnp.where(raw > 20.0, raw, jnp.log1p(jnp.exp(raw))) + 0.001
        return jnp.exp(-0.5 * ((v[:, None] - mean[None, :]) / sigma[None, :]) ** 2)

    x1, x2 = x[:, 0], x[:, 1]
    mf1 = mf(x1, mean1, raw_sigma1)
    mf2 = mf(x2, mean2, raw_sigma2)
    rule = jnp.einsum('bi,bj->bij', mf1, mf2).reshape(x.shape[0], -1)
    weights = rule / rule.sum(axis=1, keepdims=True)
    f = jnp.tanh(a1[None, :] * x1[:, None] + a2[None, :] * x2[:, None] + b[None, :])
    return jnp.sum(weights * f, axis=1)


if __name__ == "__main__":
    num_mf = 3
    num_rules = num_mf ** 2
    batch = 2000  # not a multiple of 1024: exercises padding; forces 2 grid steps

    # Deterministic parameters (same init as the module).
    mean1 = jnp.linspace(0.2, 0.8, num_mf, dtype=jnp.float32)
    mean2 = jnp.linspace(0.2, 0.8, num_mf, dtype=jnp.float32)
    raw_sigma1 = jnp.full((num_mf,), -1.0, dtype=jnp.float32)
    raw_sigma2 = jnp.full((num_mf,), -1.0, dtype=jnp.float32)

    key = jax.random.PRNGKey(0)
    k_a1, k_a2, k_b, k_x = jax.random.split(key, 4)
    a1 = jax.random.normal(k_a1, (num_rules,), dtype=jnp.float32)
    a2 = jax.random.normal(k_a2, (num_rules,), dtype=jnp.float32)
    b = jax.random.normal(k_b, (num_rules,), dtype=jnp.float32)
    x = jax.random.uniform(k_x, (batch, 2), dtype=jnp.float32)

    y = anfis_forward(x, mean1, raw_sigma1, mean2, raw_sigma2, a1, a2, b)
    y = jax.block_until_ready(y)

    ref = _reference(x, mean1, raw_sigma1, mean2, raw_sigma2, a1, a2, b)
    assert y.shape == (batch,)
    assert jnp.allclose(y, ref, atol=1e-5, rtol=1e-5)

    print("KERNEL_OK")
</pallas_src>

<mosaic_0001>
module attributes {stable_mosaic.version = 11 : i64} {
  func.func @_anfis_kernel(%arg0: i32, %arg1: memref<3xf32, #tpu.memory_space<smem>>, %arg2: memref<3xf32, #tpu.memory_space<smem>>, %arg3: memref<3xf32, #tpu.memory_space<smem>>, %arg4: memref<3xf32, #tpu.memory_space<smem>>, %arg5: memref<9xf32, #tpu.memory_space<smem>>, %arg6: memref<9xf32, #tpu.memory_space<smem>>, %arg7: memref<9xf32, #tpu.memory_space<smem>>, %arg8: memref<2x8x128xf32, #tpu.memory_space<vmem>>, %arg9: memref<8x128xf32, #tpu.memory_space<vmem>>) attributes {dimension_semantics = [#tpu.dimension_semantics<parallel>], iteration_bounds = array<i64: 2>, scalar_prefetch = 7 : i64, scratch_operands = 0 : i64, tpu.core_type = #tpu.core_type<tc>, window_params = [{transform_indices = @transform_0, window_bounds = array<i64: 2, 8, 128>}, {transform_indices = @transform_1, window_bounds = array<i64: 8, 128>}]} {
    %c0_i32 = arith.constant 0 : i32
    %c1_i32 = arith.constant 1 : i32
    %0 = arith.muli %c0_i32, %c1_i32 : i32
    %c0_i32_0 = arith.constant 0 : i32
    %1 = arith.addi %c0_i32_0, %0 : i32
    %c8_i32 = arith.constant 8 : i32
    %2 = arith.muli %1, %c8_i32 : i32
    %3 = tpu.assume_multiple %2, 8 : i32
    %c0 = arith.constant 0 : index
    %4 = arith.index_cast %3 : i32 to index
    %c0_1 = arith.constant 0 : index
    %5 = vector.load %arg8[%c0, %4, %c0_1] : memref<2x8x128xf32, #tpu.memory_space<vmem>>, vector<1x8x128xf32>
    %6 = vector.shape_cast %5 : vector<1x8x128xf32> to vector<8x128xf32>
    %c1 = arith.constant 1 : index
    %7 = arith.index_cast %3 : i32 to index
    %c0_2 = arith.constant 0 : index
    %8 = vector.load %arg8[%c1, %7, %c0_2] : memref<2x8x128xf32, #tpu.memory_space<vmem>>, vector<1x8x128xf32>
    %9 = vector.shape_cast %8 : vector<1x8x128xf32> to vector<8x128xf32>
    %c0_3 = arith.constant 0 : index
    %10 = memref.load %arg1[%c0_3] : memref<3xf32, #tpu.memory_space<smem>>
    %11 = vector.broadcast %10 : f32 to vector<8x128xf32>
    %12 = arith.subf %6, %11 : vector<8x128xf32>
    %c0_4 = arith.constant 0 : index
    %13 = memref.load %arg2[%c0_4] : memref<3xf32, #tpu.memory_space<smem>>
    %14 = arith.mulf %12, %12 : vector<8x128xf32>
    %15 = vector.broadcast %13 : f32 to vector<8x128xf32>
    %16 = arith.mulf %15, %14 : vector<8x128xf32>
    %17 = math.exp %16 : vector<8x128xf32>
    %c0_5 = arith.constant 0 : index
    %18 = memref.load %arg3[%c0_5] : memref<3xf32, #tpu.memory_space<smem>>
    %19 = vector.broadcast %18 : f32 to vector<8x128xf32>
    %20 = arith.subf %9, %19 : vector<8x128xf32>
    %c0_6 = arith.constant 0 : index
    %21 = memref.load %arg4[%c0_6] : memref<3xf32, #tpu.memory_space<smem>>
    %22 = arith.mulf %20, %20 : vector<8x128xf32>
    %23 = vector.broadcast %21 : f32 to vector<8x128xf32>
    %24 = arith.mulf %23, %22 : vector<8x128xf32>
    %25 = math.exp %24 : vector<8x128xf32>
    %c1_7 = arith.constant 1 : index
    %26 = memref.load %arg1[%c1_7] : memref<3xf32, #tpu.memory_space<smem>>
    %27 = vector.broadcast %26 : f32 to vector<8x128xf32>
    %28 = arith.subf %6, %27 : vector<8x128xf32>
    %c1_8 = arith.constant 1 : index
    %29 = memref.load %arg2[%c1_8] : memref<3xf32, #tpu.memory_space<smem>>
    %30 = arith.mulf %28, %28 : vector<8x128xf32>
    %31 = vector.broadcast %29 : f32 to vector<8x128xf32>
    %32 = arith.mulf %31, %30 : vector<8x128xf32>
    %33 = math.exp %32 : vector<8x128xf32>
    %c1_9 = arith.constant 1 : index
    %34 = memref.load %arg3[%c1_9] : memref<3xf32, #tpu.memory_space<smem>>
    %35 = vector.broadcast %34 : f32 to vector<8x128xf32>
    %36 = arith.subf %9, %35 : vector<8x128xf32>
    %c1_10 = arith.constant 1 : index
    %37 = memref.load %arg4[%c1_10] : memref<3xf32, #tpu.memory_space<smem>>
    %38 = arith.mulf %36, %36 : vector<8x128xf32>
    %39 = vector.broadcast %37 : f32 to vector<8x128xf32>
    %40 = arith.mulf %39, %38 : vector<8x128xf32>
    %41 = math.exp %40 : vector<8x128xf32>
    %c2 = arith.constant 2 : index
    %42 = memref.load %arg1[%c2] : memref<3xf32, #tpu.memory_space<smem>>
    %43 = vector.broadcast %42 : f32 to vector<8x128xf32>
    %44 = arith.subf %6, %43 : vector<8x128xf32>
    %c2_11 = arith.constant 2 : index
    %45 = memref.load %arg2[%c2_11] : memref<3xf32, #tpu.memory_space<smem>>
    %46 = arith.mulf %44, %44 : vector<8x128xf32>
    %47 = vector.broadcast %45 : f32 to vector<8x128xf32>
    %48 = arith.mulf %47, %46 : vector<8x128xf32>
    %49 = math.exp %48 : vector<8x128xf32>
    %c2_12 = arith.constant 2 : index
    %50 = memref.load %arg3[%c2_12] : memref<3xf32, #tpu.memory_space<smem>>
    %51 = vector.broadcast %50 : f32 to vector<8x128xf32>
    %52 = arith.subf %9, %51 : vector<8x128xf32>
    %c2_13 = arith.constant 2 : index
    %53 = memref.load %arg4[%c2_13] : memref<3xf32, #tpu.memory_space<smem>>
    %54 = arith.mulf %52, %52 : vector<8x128xf32>
    %55 = vector.broadcast %53 : f32 to vector<8x128xf32>
    %56 = arith.mulf %55, %54 : vector<8x128xf32>
    %57 = math.exp %56 : vector<8x128xf32>
    %58 = arith.addf %17, %33 : vector<8x128xf32>
    %59 = arith.addf %25, %41 : vector<8x128xf32>
    %60 = arith.addf %58, %49 : vector<8x128xf32>
    %61 = arith.addf %59, %57 : vector<8x128xf32>
    %62 = arith.mulf %60, %61 : vector<8x128xf32>
    %c0_14 = arith.constant 0 : index
    %63 = memref.load %arg5[%c0_14] : memref<9xf32, #tpu.memory_space<smem>>
    %64 = vector.broadcast %63 : f32 to vector<8x128xf32>
    %65 = arith.mulf %64, %6 : vector<8x128xf32>
    %c0_15 = arith.constant 0 : index
    %66 = memref.load %arg6[%c0_15] : memref<9xf32, #tpu.memory_space<smem>>
    %67 = vector.broadcast %66 : f32 to vector<8x128xf32>
    %68 = arith.mulf %67, %9 : vector<8x128xf32>
    %69 = arith.addf %65, %68 : vector<8x128xf32>
    %c0_16 = arith.constant 0 : index
    %70 = memref.load %arg7[%c0_16] : memref<9xf32, #tpu.memory_space<smem>>
    %71 = vector.broadcast %70 : f32 to vector<8x128xf32>
    %72 = arith.addf %69, %71 : vector<8x128xf32>
    %73 = math.tanh %72 : vector<8x128xf32>
    %74 = arith.mulf %25, %73 : vector<8x128xf32>
    %c1_17 = arith.constant 1 : index
    %75 = memref.load %arg5[%c1_17] : memref<9xf32, #tpu.memory_space<smem>>
    %76 = vector.broadcast %75 : f32 to vector<8x128xf32>
    %77 = arith.mulf %76, %6 : vector<8x128xf32>
    %c1_18 = arith.constant 1 : index
    %78 = memref.load %arg6[%c1_18] : memref<9xf32, #tpu.memory_space<smem>>
    %79 = vector.broadcast %78 : f32 to vector<8x128xf32>
    %80 = arith.mulf %79, %9 : vector<8x128xf32>
    %81 = arith.addf %77, %80 : vector<8x128xf32>
    %c1_19 = arith.constant 1 : index
    %82 = memref.load %arg7[%c1_19] : memref<9xf32, #tpu.memory_space<smem>>
    %83 = vector.broadcast %82 : f32 to vector<8x128xf32>
    %84 = arith.addf %81, %83 : vector<8x128xf32>
    %85 = math.tanh %84 : vector<8x128xf32>
    %86 = arith.mulf %41, %85 : vector<8x128xf32>
    %87 = arith.addf %74, %86 : vector<8x128xf32>
    %c2_20 = arith.constant 2 : index
    %88 = memref.load %arg5[%c2_20] : memref<9xf32, #tpu.memory_space<smem>>
    %89 = vector.broadcast %88 : f32 to vector<8x128xf32>
    %90 = arith.mulf %89, %6 : vector<8x128xf32>
    %c2_21 = arith.constant 2 : index
    %91 = memref.load %arg6[%c2_21] : memref<9xf32, #tpu.memory_space<smem>>
    %92 = vector.broadcast %91 : f32 to vector<8x128xf32>
    %93 = arith.mulf %92, %9 : vector<8x128xf32>
    %94 = arith.addf %90, %93 : vector<8x128xf32>
    %c2_22 = arith.constant 2 : index
    %95 = memref.load %arg7[%c2_22] : memref<9xf32, #tpu.memory_space<smem>>
    %96 = vector.broadcast %95 : f32 to vector<8x128xf32>
    %97 = arith.addf %94, %96 : vector<8x128xf32>
    %98 = math.tanh %97 : vector<8x128xf32>
    %99 = arith.mulf %57, %98 : vector<8x128xf32>
    %100 = arith.addf %87, %99 : vector<8x128xf32>
    %101 = arith.mulf %17, %100 : vector<8x128xf32>
    %c3 = arith.constant 3 : index
    %102 = memref.load %arg5[%c3] : memref<9xf32, #tpu.memory_space<smem>>
    %103 = vector.broadcast %102 : f32 to vector<8x128xf32>
    %104 = arith.mulf %103, %6 : vector<8x128xf32>
    %c3_23 = arith.constant 3 : index
    %105 = memref.load %arg6[%c3_23] : memref<9xf32, #tpu.memory_space<smem>>
    %106 = vector.broadcast %105 : f32 to vector<8x128xf32>
    %107 = arith.mulf %106, %9 : vector<8x128xf32>
    %108 = arith.addf %104, %107 : vector<8x128xf32>
    %c3_24 = arith.constant 3 : index
    %109 = memref.load %arg7[%c3_24] : memref<9xf32, #tpu.memory_space<smem>>
    %110 = vector.broadcast %109 : f32 to vector<8x128xf32>
    %111 = arith.addf %108, %110 : vector<8x128xf32>
    %112 = math.tanh %111 : vector<8x128xf32>
    %113 = arith.mulf %25, %112 : vector<8x128xf32>
    %c4 = arith.constant 4 : index
    %114 = memref.load %arg5[%c4] : memref<9xf32, #tpu.memory_space<smem>>
    %115 = vector.broadcast %114 : f32 to vector<8x128xf32>
    %116 = arith.mulf %115, %6 : vector<8x128xf32>
    %c4_25 = arith.constant 4 : index
    %117 = memref.load %arg6[%c4_25] : memref<9xf32, #tpu.memory_space<smem>>
    %118 = vector.broadcast %117 : f32 to vector<8x128xf32>
    %119 = arith.mulf %118, %9 : vector<8x128xf32>
    %120 = arith.addf %116, %119 : vector<8x128xf32>
    %c4_26 = arith.constant 4 : index
    %121 = memref.load %arg7[%c4_26] : memref<9xf32, #tpu.memory_space<smem>>
    %122 = vector.broadcast %121 : f32 to vector<8x128xf32>
    %123 = arith.addf %120, %122 : vector<8x128xf32>
    %124 = math.tanh %123 : vector<8x128xf32>
    %125 = arith.mulf %41, %124 : vector<8x128xf32>
    %126 = arith.addf %113, %125 : vector<8x128xf32>
    %c5 = arith.constant 5 : index
    %127 = memref.load %arg5[%c5] : memref<9xf32, #tpu.memory_space<smem>>
    %128 = vector.broadcast %127 : f32 to vector<8x128xf32>
    %129 = arith.mulf %128, %6 : vector<8x128xf32>
    %c5_27 = arith.constant 5 : index
    %130 = memref.load %arg6[%c5_27] : memref<9xf32, #tpu.memory_space<smem>>
    %131 = vector.broadcast %130 : f32 to vector<8x128xf32>
    %132 = arith.mulf %131, %9 : vector<8x128xf32>
    %133 = arith.addf %129, %132 : vector<8x128xf32>
    %c5_28 = arith.constant 5 : index
    %134 = memref.load %arg7[%c5_28] : memref<9xf32, #tpu.memory_space<smem>>
    %135 = vector.broadcast %134 : f32 to vector<8x128xf32>
    %136 = arith.addf %133, %135 : vector<8x128xf32>
    %137 = math.tanh %136 : vector<8x128xf32>
    %138 = arith.mulf %57, %137 : vector<8x128xf32>
    %139 = arith.addf %126, %138 : vector<8x128xf32>
    %140 = arith.mulf %33, %139 : vector<8x128xf32>
    %141 = arith.addf %101, %140 : vector<8x128xf32>
    %c6 = arith.constant 6 : index
    %142 = memref.load %arg5[%c6] : memref<9xf32, #tpu.memory_space<smem>>
    %143 = vector.broadcast %142 : f32 to vector<8x128xf32>
    %144 = arith.mulf %143, %6 : vector<8x128xf32>
    %c6_29 = arith.constant 6 : index
    %145 = memref.load %arg6[%c6_29] : memref<9xf32, #tpu.memory_space<smem>>
    %146 = vector.broadcast %145 : f32 to vector<8x128xf32>
    %147 = arith.mulf %146, %9 : vector<8x128xf32>
    %148 = arith.addf %144, %147 : vector<8x128xf32>
    %c6_30 = arith.constant 6 : index
    %149 = memref.load %arg7[%c6_30] : memref<9xf32, #tpu.memory_space<smem>>
    %150 = vector.broadcast %149 : f32 to vector<8x128xf32>
    %151 = arith.addf %148, %150 : vector<8x128xf32>
    %152 = math.tanh %151 : vector<8x128xf32>
    %153 = arith.mulf %25, %152 : vector<8x128xf32>
    %c7 = arith.constant 7 : index
    %154 = memref.load %arg5[%c7] : memref<9xf32, #tpu.memory_space<smem>>
    %155 = vector.broadcast %154 : f32 to vector<8x128xf32>
    %156 = arith.mulf %155, %6 : vector<8x128xf32>
    %c7_31 = arith.constant 7 : index
    %157 = memref.load %arg6[%c7_31] : memref<9xf32, #tpu.memory_space<smem>>
    %158 = vector.broadcast %157 : f32 to vector<8x128xf32>
    %159 = arith.mulf %158, %9 : vector<8x128xf32>
    %160 = arith.addf %156, %159 : vector<8x128xf32>
    %c7_32 = arith.constant 7 : index
    %161 = memref.load %arg7[%c7_32] : memref<9xf32, #tpu.memory_space<smem>>
    %162 = vector.broadcast %161 : f32 to vector<8x128xf32>
    %163 = arith.addf %160, %162 : vector<8x128xf32>
    %164 = math.tanh %163 : vector<8x128xf32>
    %165 = arith.mulf %41, %164 : vector<8x128xf32>
    %166 = arith.addf %153, %165 : vector<8x128xf32>
    %c8 = arith.constant 8 : index
    %167 = memref.load %arg5[%c8] : memref<9xf32, #tpu.memory_space<smem>>
    %168 = vector.broadcast %167 : f32 to vector<8x128xf32>
    %169 = arith.mulf %168, %6 : vector<8x128xf32>
    %c8_33 = arith.constant 8 : index
    %170 = memref.load %arg6[%c8_33] : memref<9xf32, #tpu.memory_space<smem>>
    %171 = vector.broadcast %170 : f32 to vector<8x128xf32>
    %172 = arith.mulf %171, %9 : vector<8x128xf32>
    %173 = arith.addf %169, %172 : vector<8x128xf32>
    %c8_34 = arith.constant 8 : index
    %174 = memref.load %arg7[%c8_34] : memref<9xf32, #tpu.memory_space<smem>>
    %175 = vector.broadcast %174 : f32 to vector<8x128xf32>
    %176 = arith.addf %173, %175 : vector<8x128xf32>
    %177 = math.tanh %176 : vector<8x128xf32>
    %178 = arith.mulf %57, %177 : vector<8x128xf32>
    %179 = arith.addf %166, %178 : vector<8x128xf32>
    %180 = arith.mulf %49, %179 : vector<8x128xf32>
    %181 = arith.addf %141, %180 : vector<8x128xf32>
    %182 = tpu.reciprocal %62 {approx = true} : vector<8x128xf32> -> vector<8x128xf32>
    %183 = arith.mulf %62, %182 : vector<8x128xf32>
    %cst = arith.constant 2.000000e+00 : f32
    %184 = vector.broadcast %cst : f32 to vector<8x128xf32>
    %185 = arith.subf %184, %183 : vector<8x128xf32>
    %186 = arith.mulf %182, %185 : vector<8x128xf32>
    %187 = arith.mulf %181, %186 : vector<8x128xf32>
    %188 = arith.index_cast %3 : i32 to index
    %c0_35 = arith.constant 0 : index
    %189 = vector.load %arg9[%188, %c0_35] : memref<8x128xf32, #tpu.memory_space<vmem>>, vector<8x128xf32>
    tpu.vector_store %arg9[%188, %c0_35], %187 {strides = array<i32>} : memref<8x128xf32, #tpu.memory_space<vmem>>, vector<8x128xf32>,
    %c1_i32_36 = arith.constant 1 : i32
    return
  }
  func.func @transform_0(%arg0: i32, %arg1: memref<3xf32, #tpu.memory_space<smem>>, %arg2: memref<3xf32, #tpu.memory_space<smem>>, %arg3: memref<3xf32, #tpu.memory_space<smem>>, %arg4: memref<3xf32, #tpu.memory_space<smem>>, %arg5: memref<9xf32, #tpu.memory_space<smem>>, %arg6: memref<9xf32, #tpu.memory_space<smem>>, %arg7: memref<9xf32, #tpu.memory_space<smem>>) -> (i32, i32, i32) {
    %c0_i32 = arith.constant 0 : i32
    %c0_i32_0 = arith.constant 0 : i32
    %c0_i32_1 = arith.constant 0 : i32
    return %c0_i32, %arg0, %c0_i32_0 : i32, i32, i32
  }
  func.func @transform_1(%arg0: i32, %arg1: memref<3xf32, #tpu.memory_space<smem>>, %arg2: memref<3xf32, #tpu.memory_space<smem>>, %arg3: memref<3xf32, #tpu.memory_space<smem>>, %arg4: memref<3xf32, #tpu.memory_space<smem>>, %arg5: memref<9xf32, #tpu.memory_space<smem>>, %arg6: memref<9xf32, #tpu.memory_space<smem>>, %arg7: memref<9xf32, #tpu.memory_space<smem>>) -> (i32, i32) {
    %c0_i32 = arith.constant 0 : i32
    %c0_i32_0 = arith.constant 0 : i32
    return %arg0, %c0_i32 : i32, i32
  }
}

</mosaic_0001>

<bundles_post_ra>
// kernel: tpu_custom_call.1
= control target key start
LH: loop header
LB: loop body
LE: loop exit
PB: predicated region body
PF: predicated region fallthrough
CT: control target
= control target key end

     0   :  { %s1161_s0 = inlined_call_operand.hbm [shape: f32[3], index: 0, kind: input, shape index: {}]   ;;  %s1162_s7 = inlined_call_operand.hbm [shape: f32[2,16,128], index: 7, kind: input, shape index: {}]   ;;  %s1163_s8 = inlined_call_operand.hbm [shape: f32[16,128], index: 8, kind: output, shape index: {}]   ;;  %s1164_s1 = inlined_call_operand.vmem [shape: f32[3], index: 1, kind: input, shape index: {}]   ;;  %s1165_s2 = inlined_call_operand.vmem [shape: f32[3], index: 2, kind: input, shape index: {}]   ;;  %s1166_s3 = inlined_call_operand.vmem [shape: f32[3], index: 3, kind: input, shape index: {}]   ;;  %s1167_s4 = inlined_call_operand.vmem [shape: f32[9], index: 4, kind: input, shape index: {}]   ;;  %s1168_s5 = inlined_call_operand.vmem [shape: f32[9], index: 5, kind: input, shape index: {}]   ;;  %s1169_s6 = inlined_call_operand.vmem [shape: f32[9], index: 6, kind: input, shape index: {}]  }
   0x1   :  { %s575_s29 = scalar_lea.hbm %s1161_s0, 16 }
   0x2   :  { %p576_p0 = scmp.ne.s32.totalorder %s1161_s0, %s575_s29  ;;  %p579_p1 = scmp.lt.u32.totalorder %s575_s29, %s1161_s0 }
   0x4   :  { %p581_p2 = pnand %p579_p1, %p576_p0 }
   0x6   :  { %584 = shalt.err (!%p581_p2)  }
   0x7   :  { %s757_s12 = smov [#allocation3]   ;;  %s15_s17 = sshll.u32 %s1164_s1, 4  ;;  %s16_s17 = int_to_ptr.vmem [resolvable:$true] %s15_s17 }
   0x8   :  { %14 = dma.hbm_to_smem %s1161_s0, 16, %s757_s12, [#allocation2] }
   0x9   :  { %s19_s20 = sshll.u32 %s1165_s2, 4  ;;  %s585_s21 = scalar_lea.vmem %s16_s17, 16  ;;  %s20_s20 = int_to_ptr.vmem [resolvable:$true] %s19_s20 }
   0xa   :  { %p586_p3 = scmp.ne.s32.totalorder %s16_s17, %s585_s21  ;;  %p590_p4 = scmp.lt.s32.totalorder %s16_s17, %s16_s17 }
   0xb   :  { %p591_p5 = scmp.lt.s32.totalorder %s585_s21, %s585_s21 }
   0xd   :  { %p592_p6 = por %p591_p5, %p590_p4 }
   0xf   :  { %p593_p7 = pnand %p592_p6, %p586_p3 }
  0x11   :  { %596 = shalt.err (!%p593_p7)  }
  0x12   :  { %s758_s22 = smov [#allocation4]   ;;  %s23_s24 = sshll.u32 %s1166_s3, 4  ;;  %s24_s24 = int_to_ptr.vmem [resolvable:$true] %s23_s24 }
  0x13   :  { %18 = dma.vmem_to_smem %s16_s17, 16, %s758_s22, [#allocation2] }
  0x14   :  { %s597_s1 = scalar_lea.vmem %s20_s20, 16  ;;  %p602_p9 = scmp.lt.s32.totalorder %s20_s20, %s20_s20 }
  0x15   :  { %p598_p8 = scmp.ne.s32.totalorder %s20_s20, %s597_s1  ;;  %p603_p10 = scmp.lt.s32.totalorder %s597_s1, %s597_s1 }
  0x17   :  { %p604_p11 = por %p603_p10, %p602_p9 }
  0x19   :  { %p605_p12 = pnand %p604_p11, %p598_p8 }
  0x1b   :  { %608 = shalt.err (!%p605_p12)  }
  0x1c   :  { %s759_s2 = smov [#allocation5]   ;;  %s609_s25 = scalar_lea.vmem %s24_s24, 16 }
  0x1d   :  { %22 = dma.vmem_to_smem %s20_s20, 16, %s759_s2, [#allocation2] }
  0x1e   :  { %p610_p13 = scmp.ne.s32.totalorder %s24_s24, %s609_s25  ;;  %p614_p0 = scmp.lt.s32.totalorder %s24_s24, %s24_s24 }
  0x1f   :  { %p615_p1 = scmp.lt.s32.totalorder %s609_s25, %s609_s25 }
  0x21   :  { %p616_p2 = por %p615_p1, %p614_p0 }
  0x23   :  { %p617_p3 = pnand %p616_p2, %p610_p13 }
  0x25   :  { %620 = shalt.err (!%p617_p3)  }
  0x26   :  { %s760_s26 = smov [#allocation6]   ;;  %s27_s28 = sshll.u32 %s1167_s4, 4  ;;  %s28_s28 = int_to_ptr.vmem [resolvable:$true] %s27_s28 }
  0x27   :  { %26 = dma.vmem_to_smem %s24_s24, 16, %s760_s26, [#allocation2] }
  0x28   :  { %s31_s9 = sshll.u32 %s1168_s5, 4  ;;  %s621_s10 = scalar_lea.vmem %s28_s28, 16  ;;  %s32_s9 = int_to_ptr.vmem [resolvable:$true] %s31_s9 }
  0x29   :  { %p622_p4 = scmp.ne.s32.totalorder %s28_s28, %s621_s10  ;;  %p626_p5 = scmp.lt.s32.totalorder %s28_s28, %s28_s28 }
  0x2a   :  { %p627_p6 = scmp.lt.s32.totalorder %s621_s10, %s621_s10 }
  0x2c   :  { %p628_p7 = por %p627_p6, %p626_p5 }
  0x2e   :  { %p629_p8 = pnand %p628_p7, %p622_p4 }
  0x30   :  { %632 = shalt.err (!%p629_p8)  }
  0x31   :  { %s761_s11 = smov [#allocation7]   ;;  %s633_s12 = scalar_lea.vmem %s32_s9, 16 }
  0x32   :  { %30 = dma.vmem_to_smem %s28_s28, 16, %s761_s11, [#allocation2] }
  0x33   :  { %p634_p9 = scmp.ne.s32.totalorder %s32_s9, %s633_s12  ;;  %p638_p10 = scmp.lt.s32.totalorder %s32_s9, %s32_s9 }
  0x34   :  { %p639_p11 = scmp.lt.s32.totalorder %s633_s12, %s633_s12 }
  0x36   :  { %p640_p12 = por %p639_p11, %p638_p10 }
  0x38   :  { %p641_p13 = pnand %p640_p12, %p634_p9 }
  0x3a   :  { %644 = shalt.err (!%p641_p13)  }
  0x3b   :  { %s762_s4 = smov [#allocation8]   ;;  %s35_s14 = sshll.u32 %s1169_s6, 4  ;;  %s36_s14 = int_to_ptr.vmem [resolvable:$true] %s35_s14 }
  0x3c   :  { %34 = dma.vmem_to_smem %s32_s9, 16, %s762_s4, [#allocation2] }
  0x3d   :  { %s645_s15 = scalar_lea.vmem %s36_s14, 16  ;;  %p650_p1 = scmp.lt.s32.totalorder %s36_s14, %s36_s14 }
  0x3e   :  { %p646_p0 = scmp.ne.s32.totalorder %s36_s14, %s645_s15  ;;  %p651_p2 = scmp.lt.s32.totalorder %s645_s15, %s645_s15 }
  0x40   :  { %p652_p3 = por %p651_p2, %p650_p1 }
  0x42   :  { %p653_p4 = pnand %p652_p3, %p646_p0 }
  0x44   :  { %656 = shalt.err (!%p653_p4)  }
  0x45   :  { %s763_s16 = smov [#allocation9]  }
  0x46   :  { %38 = dma.vmem_to_smem %s36_s14, 16, %s763_s16, [#allocation2] }
  0x47   :  { %731 = dma.done.wait [#allocation2], 112 }
  0x48   :  { %732 = vsyncadd [#allocation2], 4294967184 }
  0x49   :  { %40 = sfence }
  0x4a   :  { %41 = vsyncpa [#allocation11], 0 }
  0x4b   :  { %43 = vsyncpa [#allocation11 + $0x1], 0 }
  0x4c   :  { %44 = vsyncpa [#allocation12], 0 }
  0x4d   :  { %46 = vsyncpa [#allocation12 + $0x1], 0  ;;  %s844_s17 = smov 0   ;;  %s846_s6 = smov 0  }
  0x4e   :  { %s848_s18 = smov 0   ;;  %s850_s19 = smov 0  }
  0x4f LB: > { %s865_s20 = sadd.s32 4294967295, %s755_s19   ;;  %s442_s21 = sadd.s32 4294967294, %s755_s19   ;;  %s755_s19 = sphi %s850_s19, %s1183_s19   ;;  %s751_s18 = sphi %s848_s18, %s1182_s18   ;;  %s747_s6 = sphi %s846_s6, %s1181_s6   ;;  %s743_s17 = sphi %s844_s17, %s1180_s17  }
  0x50   : > { %s869_s22 = sadd.s32 1, %s755_s19   ;;  %s59_s0 = sadd.s32 1, %s751_s18 }
  0x51   : > { %s56_s23 = ssub.s32 %s755_s19, %s869_s22  ;;  %p66_p5 = scmp.ne.s32.totalorder %s751_s18, %s747_s6 }
  0x52   : > { %p57_p6 = scmp.eq.s32.totalorder %s56_s23, 0  ;;  %p67_p7 = scmp.eq.s32.totalorder %s755_s19, 0 }
  0x53   : > { %p72_p8 = scmp.ne.s32.totalorder %s747_s6, %s743_s17  ;;  %p73_p9 = scmp.eq.s32.totalorder %s865_s20, 0 }
  0x54   : > { %s881_s24 = scalar_select %p57_p6, %s751_s18, %s59_s0  }
  0x55   : > { %p883_p10 = por %p67_p7, %p66_p5  ;;  %p887_p11 = por %p73_p9, %p72_p8 }
  0x56   : > { %p96_p12 = scmp.eq.s32.totalorder %s865_s20, 1  ;;  %p102_p13 = scmp.eq.s32.totalorder %s442_s21, 1 }
  0x57   : > { %p499_p1 = scmp.lt.s32.totalorder %s755_s19, 2  ;;  %s122_s3 = sand.u32 1, %s751_s18  }
  0x58   : > { %p894_p2 = por %p96_p12, %p66_p5  ;;  %p898_p3 = por %p102_p13, %p72_p8 }
  0x59   : > { %s446_s27 = sshll.u32 %s755_s19, 7  ;;  %s445_s28 = sshll.u32 %s122_s3, 4 }
  0x5a   : > { %s1173_s25 = scalar_select %p894_p2, 1, 0 }
  0x5b   : > { %s1174_s26 = scalar_select %p898_p3, 1, 0 }
  0x5c   : > { %s907_s9 = scalar_lea.hbm %s1162_s7, %s446_s27  ;;  %s126_s10 = scalar_lea.vmem [#allocation10], %s445_s28 }
  0x5d   : > { %s132_s11 = sshll.u32 %s126_s10, 4  ;;  %p911_p4 = pnand %p499_p1, %p883_p10  ;;  %s915_s11 = int_to_ptr.vmem [resolvable:$true] %s132_s11 }
  0x5e   : > { %s918_s4 = scalar_lea.sflag [#allocation11], %s122_s3  ;;  %s657_s5 = scalar_lea.hbm %s907_s9, 256 }
  0x5f   : > { %p658_p6 = scmp.ne.s32.totalorder %s907_s9, %s657_s5  ;;  %p659_p7 = pneg %p911_p4 }
  0x60   : > { %s662_s15 = scalar_lea.hbm %s1162_s7, 512  ;;  %p663_p10 = scmp.lt.u32.totalorder %s907_s9, %s1162_s7 }
  0x61   : > { %p660_p8 = pnand %p659_p7, %p658_p6  ;;  %p664_p12 = scmp.lt.u32.totalorder %s662_s15, %s657_s5 }
  0x62   : > { %p666_p1 = scmp.lt.u32.totalorder %s657_s5, %s907_s9 }
  0x63   : > { %p661_p9 = pneg %p660_p8  ;;  %p665_p13 = por %p664_p12, %p663_p10 }
  0x65   : > { %p667_p0 = por %p666_p1, %p665_p13 }
  0x67   : > { %p668_p5 = pnand %p667_p0, %p661_p9 }
  0x69   : > { %671 = shalt.err (!%p668_p5)
}
  0x6a   : > { %s672_s0 = scalar_lea.vmem %s915_s11, 256  ;;  %s764_s23 = smov [#allocation10]  }
  0x6b   : > { %p673_p6 = scmp.ne.s32.totalorder %s915_s11, %s672_s0  ;;  %s677_s1 = sshll.u32 %s764_s23, 4  ;;  %s678_s1 = int_to_ptr.vmem [resolvable:$false] %s677_s1 }
  0x6c   : > { %s679_s3 = scalar_lea.vmem %s678_s1, 512  ;;  %p680_p2 = scmp.lt.s32.totalorder %s915_s11, %s678_s1 }
  0x6d   : > { %p675_p8 = pnand %p673_p6, %p659_p7  ;;  %p681_p10 = scmp.lt.s32.totalorder %s679_s3, %s672_s0 }
  0x6f   : > { %p676_p3 = pneg %p675_p8  ;;  %p682_p12 = por %p681_p10, %p680_p2 }
  0x71   : > { %p683_p13 = pnand %p682_p12, %p676_p3 }
  0x73   : > { %686 = shalt.err (!%p683_p13)
}
  0x74   : > { %s765_s27 = smov 256   ;;  %s766_s28 = smov 128  }
  0x75   : > { %s767_s29 = smov 8   ;;  %p140_p0 = scmp.lt.s32.totalorder %s755_s19, 3 }
  0x76   : > { %494 = dma.hbm_to_vmem [thread:$0]  (!%p911_p4), %s907_s9, 256, %s915_s11, %s918_s4, %s765_s27, %s766_s28, %s767_s29  }
  0x77   : > { %p1176_p5 = scmp.ge.s32.totalorder %s755_s19, 1 }
  0x79   : > { %p141_p7 = pnand %p1176_p5, %p140_p0 }
  0x7a   : > { %s950_s30 = sand.u32 (!%p141_p7), 1, %s747_s6  }
  0x7b   : > { %144 = sbr.rel (%p141_p7) target bundleno = 207 (0xcf), region = 24  ;;  %s448_s10 = sshll.u32 (!%p141_p7), %s950_s30, 4 }
  0x7c   : > { %s147_s5 = scalar_lea.sflag (!%p141_p7), [#allocation11], %s950_s30  ;;  %s150_s13 = scalar_lea.vmem (!%p141_p7), [#allocation10], %s448_s10 }
  0x82   : > { %734 = dma.done.wait (%p887_p11), %s147_s5, 256  }
  0x83   : > { %736 = vsyncadd (%p887_p11), %s147_s5, 4294967040  ;;  %s173_s12 = sld [smem:[#allocation3]]  ;;  %s451_s14 = sld [smem:[#allocation3 + $0x1]]  ;;  %v970_v0 = vld [vmem:[%s150_s13] sm:$0xff]  ;;  %v972_v1 = vld [vmem:[%s150_s13 + $0x8] sm:$0xff] }
  0x84   : > { %s958_s9 = sld [smem:[#allocation4]]  ;;  %s962_s15 = sld [smem:[#allocation4 + $0x1]] }
  0x85   : > { %s182_s11 = sld [smem:[#allocation5]]  ;;  %s453_s16 = sld [smem:[#allocation5 + $0x1]] }
  0x86   : > { %s960_s4 = sld [smem:[#allocation6]]  ;;  %s964_s21 = sld [smem:[#allocation6 + $0x1]] }
  0x87   : > { %s455_s0 = sld [smem:[#allocation3 + $0x2]]  ;;  %s976_s3 = sld [smem:[#allocation7]] }
  0x88   : > { %s966_s23 = sld [smem:[#allocation4 + $0x2]]  ;;  %s979_s27 = sld [smem:[#allocation8]] }
  0x89   : > { %s968_s2 = sld [smem:[#allocation5 + $0x2]]  ;;  %v174_v2 = vstv %s173_s12  ;;  %v192_v8 = vstv %s451_s14  ;;  %s986_s28 = sld [smem:[#allocation9]] }
  0x8a   : > { %s974_s1 = sld [smem:[#allocation6 + $0x2]]  ;;  %v175_v3 = vsub.f32 %v970_v0, %v174_v2  ;;  %v178_v5 = vstv %s958_s9  ;;  %v193_v10 = vsub.f32 %v970_v0, %v192_v8  ;;  %v196_v11 = vstv %s962_s15  ;;  %s990_s29 = sld [smem:[#allocation7 + $0x1]] }
  0x8b   : > { %v183_v4 = vstv %s182_s11  ;;  %v201_v12 = vstv %s453_s16  ;;  %s992_s10 = sld [smem:[#allocation8 + $0x1]]  ;;  %s1000_s13 = sld [smem:[#allocation7 + $0x2]] }
  0x8c   : > { %v184_v6 = vsub.f32 %v972_v1, %v183_v4  ;;  %v187_v7 = vstv %s960_s4  ;;  %v177_v9 = vmul.f32 %v175_v3, %v175_v3  ;;  %v202_v14 = vsub.f32 %v972_v1, %v201_v12  ;;  %s996_s5 = sld [smem:[#allocation9 + $0x1]]  ;;  %s1002_s12 = sld [smem:[#allocation8 + $0x2]] }
  0x8d   : > { %v205_v15 = vstv %s964_s21  ;;  %v210_v16 = vstv %s455_s0  ;;  %v195_v18 = vmul.f32 %v193_v10, %v193_v10  ;;  %s1005_s9 = sld [smem:[#allocation9 + $0x2]]  ;;  %v233_v31 = vstv %s976_s3  ;;  %s1009_s11 = sld [smem:[#allocation7 + $0x3]] }
  0x8e   : > { %v186_v13 = vmul.f32 %v184_v6, %v184_v6  ;;  %v179_v17 = vmul.f32 %v178_v5, %v177_v9  ;;  %v211_v19 = vsub.f32 %v970_v0, %v210_v16  ;;  %v214_v20 = vstv %s966_s23  ;;  %s1011_s4 = sld [smem:[#allocation8 + $0x3]]  ;;  %s1015_s15 = sld [smem:[#allocation7 + $0x4]] }
  0x8f   : > { %v204_v22 = vmul.f32 %v202_v14, %v202_v14  ;;  %v219_v23 = vstv %s968_s2  ;;  %v197_v26 = vmul.f32 %v196_v11, %v195_v18  ;;  %v236_v32 = vstv %s979_s27  ;;  %s1013_s14 = sld [smem:[#allocation9 + $0x3]]  ;;  %s1019_s16 = sld [smem:[#allocation8 + $0x4]] }
  0x90   : > { %v188_v21 = vmul.f32 %v187_v7, %v186_v13  ;;  %v223_v24 = vstv %s974_s1  ;;  %v180_v25 = vmul.f32 1.442695, %v179_v17  ;;  %v213_v27 = vmul.f32 %v211_v19, %v211_v19  ;;  %s1021_s21 = sld [smem:[#allocation9 + $0x4]]  ;;  %s1024_s0 = sld [smem:[#allocation7 + $0x5]] }
  0x91   : > { %v220_v28 = vsub.f32 %v972_v1, %v219_v23  ;;  %v206_v30 = vmul.f32 %v205_v15, %v204_v22  ;;  %v198_v33 = vmul.f32 1.442695, %v197_v26  ;;  %v234_v37 = vmul.f32 %v233_v31, %v970_v0  ;;  %s1028_s23 = sld [smem:[#allocation8 + $0x5]]  ;;  %s1037_s1 = sld [smem:[#allocation7 + $0x6]] }
  0x92   : > { %v189_v29 = vmul.f32 1.442695, %v188_v21  ;;  %543 = vpow2.f32 %v180_v25  ;;  %v215_v34 = vmul.f32 %v214_v20, %v213_v27  ;;  %v237_v38 = vmul.f32 %v972_v1, %v236_v32  ;;  %s1030_s2 = sld [smem:[#allocation9 + $0x5]]  ;;  %s1039_s3 = sld [smem:[#allocation8 + $0x6]] }
  0x93   : > { %v222_v35 = vmul.f32 %v220_v28, %v220_v28  ;;  %v207_v36 = vmul.f32 1.442695, %v206_v30  ;;  %v240_v41 = vstv %s986_s28  ;;  %v245_v43 = vstv %s990_s29  ;;  %s1046_s27 = sld [smem:[#allocation9 + $0x6]]  ;;  %s1050_s28 = sld [smem:[#allocation7 + $0x7]] }
  0x94   : > { %545 = vpow2.f32 %v189_v29  ;;  %v216_v39 = vmul.f32 1.442695, %v215_v34  ;;  %v238_v42 = vadd.f32 %v237_v38, %v234_v37  ;;  %v248_v44 = vstv %s992_s10  ;;  %s1052_s29 = sld [smem:[#allocation8 + $0x7]]  ;;  %p1177_p2 = scmp.ne.s32.totalorder %s1173_s25, 0 }
  0x95   : > { %547 = vpow2.f32 %v198_v33  ;;  %v224_v40 = vmul.f32 %v223_v24, %v222_v35  ;;  %v246_v46 = vmul.f32 %v245_v43, %v970_v0  ;;  %v249_v47 = vmul.f32 %v972_v1, %v248_v44  ;;  %s1061_s10 = sld [smem:[#allocation9 + $0x7]] }
  0x96   : > { %549 = vpow2.f32 %v207_v36  ;;  %v241_v48 = vadd.f32 %v240_v41, %v238_v42  ;;  %v252_v49 = vstv %s996_s5  ;;  %v258_v50 = vstv %s1000_s13  ;;  %s1063_s5 = sld [smem:[#allocation7 + $0x8]] }
  0x97   : > { %551 = vpow2.f32 %v216_v39  ;;  %v225_v45 = vmul.f32 1.442695, %v224_v40  ;;  %v261_v51 = vstv %s1002_s12  ;;  %v250_v52 = vadd.f32 %v249_v47, %v246_v46  ;;  %s1071_s13 = sld [smem:[#allocation8 + $0x8]] }
  0x98   : > { %v259_v53 = vmul.f32 %v258_v50, %v970_v0  ;;  %v262_v54 = vmul.f32 %v972_v1, %v261_v51  ;;  %v265_v55 = vstv %s1005_s9  ;;  %v272_v56 = vstv %s1009_s11  ;;  %s1083_s12 = sld [smem:[#allocation9 + $0x8]]  ;;  %s449_s9 = sshll.u32 %s950_s30, 3 }
  0x99   : > { %553 = vpow2.f32 %v225_v45  ;;  %v275_v57 = vstv %s1011_s4  ;;  %v253_v58 = vadd.f32 %v252_v49, %v250_v52  ;;  %v273_v60 = vmul.f32 %v272_v56, %v970_v0  ;;  %s484_s11 = sshll.u32 %s865_s20, 7  ;;  %s168_s4 = scalar_lea.vmem [#allocation13], %s449_s9 }
  0x9a   : > { %555 = vtanh.f32 %v241_v48  ;;  %v263_v59 = vadd.f32 %v262_v54, %v259_v53  ;;  %v276_v61 = vmul.f32 %v972_v1, %v275_v57  ;;  %v279_v62 = vstv %s1013_s14  ;;  %s371_s14 = sshll.u32 %s168_s4, 4  ;;  %s768_s20 = smov [#allocation13]   ;;  %s1119_s14 = int_to_ptr.vmem [resolvable:$true] %s371_s14 }
  0x9b   : > { %v284_v63 = vstv %s1015_s15  ;;  %v287_v2 = vstv %s1019_s16  ;;  %v291_v3 = vstv %s1021_s21  ;;  %557 = vtanh.f32 %v253_v58  ;;  %s1117_s21 = scalar_lea.hbm %s1163_s8, %s484_s11 }
  0x9c   : > { %v1058_v4 = vpop.eup %543  ;;  %v266_v5 = vadd.f32 %v265_v55, %v263_v59  ;;  %v277_v6 = vadd.f32 %v276_v61, %v273_v60  ;;  %v285_v7 = vmul.f32 %v284_v63, %v970_v0  ;;  %v288_v9 = vmul.f32 %v972_v1, %v287_v2 }
  0x9d   : > { %v297_v10 = vstv %s1024_s0  ;;  %v300_v11 = vstv %s1028_s23  ;;  %v304_v12 = vstv %s1030_s2  ;;  %v312_v20 = vstv %s1037_s1  ;;  %s358_s0 = scalar_lea.sflag [#allocation12], %s950_s30  ;;  %s687_s23 = scalar_lea.vmem %s1119_s14, 128 }
  0x9e   : > { %v1065_v8 = vpop.eup %545  ;;  %559 = vtanh.f32 %v266_v5  ;;  %v280_v14 = vadd.f32 %v279_v62, %v277_v6  ;;  %v298_v15 = vmul.f32 %v297_v10, %v970_v0  ;;  %v301_v16 = vmul.f32 %v972_v1, %v300_v11  ;;  %p688_p11 = scmp.ne.s32.totalorder %s1119_s14, %s687_s23  ;;  %s691_s2 = sshll.u32 %s768_s20, 4  ;;  %s692_s2 = int_to_ptr.vmem [resolvable:$false] %s691_s2 }
  0x9f   : > { %v1073_v13 = vpop.eup %547  ;;  %v289_v19 = vadd.f32 %v288_v9, %v285_v7  ;;  %v315_v21 = vstv %s1039_s3  ;;  %v313_v25 = vmul.f32 %v312_v20, %v970_v0  ;;  %v319_v31 = vstv %s1046_s27  ;;  %s693_s1 = scalar_lea.vmem %s692_s2, 256  ;;  %p694_p9 = scmp.lt.s32.totalorder %s1119_s14, %s692_s2 }
  0xa0   : > { %v1077_v17 = vpop.eup %549  ;;  %v227_v18 = vadd.f32 %v1073_v13, %v1058_v4  ;;  %561 = vtanh.f32 %v280_v14  ;;  %v302_v24 = vadd.f32 %v301_v16, %v298_v15  ;;  %v316_v28 = vmul.f32 %v972_v1, %v315_v21  ;;  %p689_p3 = pnand %p688_p11, %p1177_p2  ;;  %p695_p1 = scmp.lt.s32.totalorder %s693_s1, %s687_s23 }
  0xa1   : > { %v1085_v22 = vpop.eup %551  ;;  %v228_v23 = vadd.f32 %v1077_v17, %v1065_v8  ;;  %v292_v27 = vadd.f32 %v291_v3, %v289_v19  ;;  %v324_v32 = vstv %s1050_s28  ;;  %v327_v33 = vstv %s1052_s29 }
  0xa2   : > { %v229_v26 = vadd.f32 %v1085_v22, %v227_v18  ;;  %v305_v30 = vadd.f32 %v304_v12, %v302_v24  ;;  %v317_v36 = vadd.f32 %v316_v28, %v313_v25  ;;  %v325_v37 = vmul.f32 %v324_v32, %v970_v0  ;;  %p690_p4 = pneg %p689_p3  ;;  %p696_p6 = por %p695_p1, %p694_p9 }
  0xa3   : > { %v554_v29 = vpop.eup %553  ;;  %563 = vtanh.f32 %v292_v27  ;;  %v328_v38 = vmul.f32 %v972_v1, %v327_v33  ;;  %v331_v39 = vstv %s1061_s10  ;;  %v337_v40 = vstv %s1063_s5 }
  0xa4   : > { %v556_v34 = vpop.eup %555  ;;  %v230_v35 = vadd.f32 %v554_v29, %v228_v23  ;;  %565 = vtanh.f32 %v305_v30  ;;  %v320_v42 = vadd.f32 %v319_v31, %v317_v36  ;;  %v338_v43 = vmul.f32 %v337_v40, %v970_v0  ;;  %p697_p8 = pnand %p696_p6, %p690_p4 }
  0xa5   : > { %v340_v44 = vstv %s1071_s13  ;;  %v558_v45 = vpop.eup %557  ;;  %v329_v46 = vadd.f32 %v328_v38, %v325_v37  ;;  %v344_v48 = vstv %s1083_s12  ;;  %v243_v52 = vmul.f32 %v556_v34, %v1065_v8 }
  0xa6   : > { %v231_v41 = vmul.f32 %v230_v35, %v229_v26  ;;  %v341_v47 = vmul.f32 %v972_v1, %v340_v44  ;;  %567 = vtanh.f32 %v320_v42  ;;  %v255_v53 = vmul.f32 %v558_v45, %v1077_v17 }
  0xa7   : > { %v332_v50 = vadd.f32 %v331_v39, %v329_v46 }
  0xa8   : > { %v560_v49 = vpop.eup %559  ;;  %v342_v51 = vadd.f32 %v341_v47, %v338_v43  ;;  %569 = vrcp.f32 %v231_v41  ;;  %v256_v57 = vadd.f32 %v255_v53, %v243_v52 }
  0xa9   : > { %571 = vtanh.f32 %v332_v50  ;;  %v268_v58 = vmul.f32 %v560_v49, %v554_v29 }
  0xaa   : > { %v562_v54 = vpop.eup %561  ;;  %v345_v55 = vadd.f32 %v344_v48, %v342_v51 }
  0xab   : > { %v282_v0 = vmul.f32 %v562_v54, %v1065_v8  ;;  %v269_v63 = vadd.f32 %v268_v58, %v256_v57 }
  0xac   : > { %573 = vtanh.f32 %v345_v55 }
  0xad   : > { %v564_v56 = vpop.eup %563  ;;  %v270_v9 = vmul.f32 %v1058_v4, %v269_v63 }
  0xae   : > { %v566_v1 = vpop.eup %565  ;;  %v294_v59 = vmul.f32 %v564_v56, %v1077_v17 }
  0xaf   : > { %v307_v60 = vmul.f32 %v566_v1, %v554_v29 }
  0xb0   : > { %v295_v61 = vadd.f32 %v294_v59, %v282_v0  ;;  %v568_v62 = vpop.eup %567 }
  0xb1   : > { %v322_v5 = vmul.f32 %v568_v62, %v1065_v8 }
  0xb2   : > { %v570_v2 = vpop.eup %569  ;;  %v308_v3 = vadd.f32 %v307_v60, %v295_v61 }
  0xb3   : > { %v352_v6 = vmul.f32 %v570_v2, %v231_v41  ;;  %v572_v7 = vpop.eup %571 }
  0xb4   : > { %v309_v10 = vmul.f32 %v1073_v13, %v308_v3  ;;  %v334_v11 = vmul.f32 %v572_v7, %v1077_v17 }
  0xb5   : > { %v353_v16 = vsub.f32 2.0, %v352_v6 }
  0xb6   : > { %v574_v12 = vpop.eup %573  ;;  %v335_v14 = vadd.f32 %v334_v11, %v322_v5  ;;  %v310_v18 = vadd.f32 %v309_v10, %v270_v9 }
  0xb7   : > { %v347_v15 = vmul.f32 %v574_v12, %v554_v29  ;;  %v354_v8 = vmul.f32 %v570_v2, %v353_v16 }
  0xb9   : > { %v348_v19 = vadd.f32 %v347_v15, %v335_v14 }
  0xbb   : > { %v349_v20 = vmul.f32 %v1085_v22, %v348_v19 }
  0xbd   : > { %v350_v4 = vadd.f32 %v349_v20, %v310_v18 }
  0xbf   : > { %v355_v21 = vmul.f32 %v354_v8, %v350_v4 }
  0xc1   : > { %356 = vst [vmem:[%s168_s4] sm:$0xff] %v355_v21 }
  0xc2   : > { %700 = shalt.err (!%p697_p8)
}
  0xc3   : > { %s701_s30 = scalar_lea.hbm %s1117_s21, 128  ;;  %s705_s28 = scalar_lea.hbm %s1163_s8, 256 }
  0xc4   : > { %p702_p10 = scmp.ne.s32.totalorder %s1117_s21, %s701_s30  ;;  %p706_p0 = scmp.lt.u32.totalorder %s1117_s21, %s1163_s8 }
  0xc5   : > { %p707_p5 = scmp.lt.u32.totalorder %s705_s28, %s701_s30  ;;  %p709_p11 = scmp.lt.u32.totalorder %s701_s30, %s1117_s21 }
  0xc6   : > { %p703_p12 = pnand %p702_p10, %p1177_p2 }
  0xc7   : > { %p708_p7 = por %p707_p5, %p706_p0 }
  0xc8   : > { %p704_p13 = pneg %p703_p12 }
  0xc9   : > { %p710_p3 = por %p709_p11, %p708_p7 }
  0xcb   : > { %p711_p4 = pnand %p710_p3, %p704_p13 }
  0xcd   : > { %714 = shalt.err (!%p711_p4)
}
  0xce   : > { %489 = dma.vmem_to_hbm [thread:$0]  (%p1177_p2), %s1119_s14, 128, %s1117_s21, %s358_s0  }
  0xcf PF: > { %s383_s5 = sand.u32 1, %s743_s17   ;;  %p1178_p9 = scmp.ne.s32.totalorder %s1174_s26, 0 }
  0xd0   : > { %p1179_p1 = scmp.ge.s32.totalorder %s755_s19, 2  ;;  %s384_s13 = scalar_lea.sflag [#allocation12], %s383_s5 }
  0xd2   : > { %p496_p6 = pnand %p1179_p1, %p1178_p9 }
  0xd4   : > { %738 = dma.done.wait (!%p496_p6), %s384_s13, 128  }
  0xd5   : > { %740 = vsyncadd (!%p496_p6), %s384_s13, 4294967168  ;;  %p49_p8 = scmp.ge.s32.totalorder %s869_s22, 4   ;;  %s1180_s17 = smov %s747_s6 }
  0xd6   : > { %s1181_s6 = smov %s751_s18  ;;  %s1182_s18 = smov %s881_s24 }
  0xd7   : > { %s1183_s19 = smov %s869_s22  ;;  %51 = sbr.rel (!%p49_p8) target bundleno = 79 (0x4f), region = 70 }
  0xde   :  { %389 = vsyncpa [#allocation11], 1 }
  0xdf   :  { %391 = vsyncpa [#allocation11 + $0x1], 1 }
  0xe0   :  { %392 = vsyncpa [#allocation12], 1 }
  0xe1   :  { %394 = vsyncpa [#allocation12 + $0x1], 1 }

</bundles_post_ra>
